<compile_context>
chip_gen: v7x
topology: tpu7x:2x2x1
jax: 0.10.0
libtpu: 0.0.40
codegen_flags: <defaults>
</compile_context>

<pallas_src>
import jax
import jax.numpy as jnp
from jax.experimental import pallas as pl
from jax.experimental.pallas import tpu as pltpu


def _fused_sage_kernel(x_ref, w_ref, out_ref):
    """One MXU matmul per batch tile: (tb, K) @ (K, N_pad) -> (tb, N_pad)."""
    out_ref[...] = jnp.dot(
        x_ref[...], w_ref[...], preferred_element_type=jnp.float32
    ).astype(out_ref.dtype)


def _round_up(x, m):
    return -(-x // m) * m


def _pick_batch_tile(B, K, n_pad, in_bytes, out_bytes,
                     vmem_budget=20 * 1024 * 1024):
    """Largest batch tile whose pipelined buffers fit a conservative VMEM budget
    (safe on v7x 64 MiB / v5e 16 MiB scoped default), with >= 2 grid steps
    whenever the batch can be split (v7x megacore + DMA/compute overlap)."""
    def tile_bytes(tb):
        # double-buffered input tile + double-buffered output tile + weight.
        return (2 * tb * K * in_bytes
                + 2 * tb * n_pad * out_bytes
                + 2 * K * n_pad * in_bytes)

    tb = 8
    for cand in (1024, 512, 256, 128, 64, 32, 16, 8):
        if tile_bytes(cand) <= vmem_budget:
            tb = cand
            break
    if B >= 16:
        # Cap so the grid has at least 2 steps (keep tb a multiple of 8).
        tb = min(tb, max(_round_up(-(-B // 2), 8), 8))
    else:
        tb = min(tb, max(_round_up(B, 8), 8))
    return tb


def sage_layer(neighbor_feats, self_feats, num_sample, params, *, use_bf16=True):
    """Pallas implementation of SAGELayer.forward (concat=True, bias=False, act=id)."""
    weight = params["weight"].astype(jnp.float32)            # (C_in, O)
    self_weight = params["self_weight"].astype(jnp.float32)  # (C_in, O)
    C_in, O = weight.shape
    assert self_weight.shape == (C_in, O)
    S = int(num_sample)

    self_f = self_feats.reshape(-1, C_in)        # (B, C_in)
    neigh = neighbor_feats.reshape(-1, S * C_in)  # (B, S*C_in) lane-dense, no 3-D pad
    B = self_f.shape[0]
    assert neigh.shape[0] == B

    K = (S + 1) * C_in
    N = 2 * O
    n_pad = _round_up(N, 128)                     # lane-dense output stores

    # Block weight: mean folded into the fp32 neighbor weight, self weight in the
    # second column block, zero padding to n_pad lanes.
    w_neigh = jnp.tile(weight, (S, 1)) * (1.0 / S)          # (S*C_in, O)
    w_full = jnp.zeros((K, n_pad), jnp.float32)
    w_full = w_full.at[: S * C_in, :O].set(w_neigh)
    w_full = w_full.at[S * C_in:, O:N].set(self_weight)

    x = jnp.concatenate([neigh, self_f], axis=-1)           # (B, K)

    compute_dtype = jnp.bfloat16 if use_bf16 else jnp.float32
    x = x.astype(compute_dtype)                  # halves dominant HBM traffic
    w_full = w_full.astype(compute_dtype)

    in_bytes = jnp.dtype(compute_dtype).itemsize
    tb = _pick_batch_tile(B, K, n_pad, in_bytes, out_bytes=4)
    b_pad = _round_up(B, tb)
    if b_pad != B:                               # handles any B (incl. primes)
        x = jnp.pad(x, ((0, b_pad - B), (0, 0)))

    grid = (b_pad // tb,)

    out = pl.pallas_call(
        _fused_sage_kernel,
        out_shape=jax.ShapeDtypeStruct((b_pad, n_pad), jnp.float32),
        grid=grid,
        in_specs=[
            pl.BlockSpec((tb, K), lambda i: (i, 0)),
            # Constant index_map -> weight stays resident across grid steps.
            # (At production C_in*O one could also single-buffer it.)
            pl.BlockSpec((K, n_pad), lambda i: (0, 0)),
        ],
        out_specs=pl.BlockSpec((tb, n_pad), lambda i: (i, 0)),
        compiler_params=pltpu.CompilerParams(
            dimension_semantics=("parallel",),   # batch tiles split across TCs (v7x)
            vmem_limit_bytes=32 * 1024 * 1024,   # raise v5e's 16 MiB default; safe on v7x
        ),
    )(x, w_full)

    return out[:B, :N]


def _reference(neighbor_feats, self_feats, num_sample, params):
    """Pure-JAX reference mirroring the PyTorch forward (for verification)."""
    weight = params["weight"]
    self_weight = params["self_weight"]
    C_in, _ = weight.shape
    neigh = neighbor_feats.reshape(-1, num_sample, C_in).mean(axis=-2)
    out = neigh @ weight
    x_i = self_feats.reshape(-1, C_in) @ self_weight
    return jnp.concatenate([out, x_i], axis=-1)


def init_params(key, in_channels, out_channels):
    """Glorot init matching the PyTorch module's parameter shapes."""
    k1, k2 = jax.random.split(key, 2)

    def glorot(k, shape):  # torch_geometric glorot: U(-sqrt(6/(fi+fo)), +sqrt(...))
        stdv = (6.0 / (shape[0] + shape[1])) ** 0.5
        return jax.random.uniform(k, shape, jnp.float32, -stdv, stdv)

    return {
        "weight": glorot(k1, (in_channels, out_channels)),
        "self_weight": glorot(k2, (in_channels, out_channels)),
    }


if __name__ == "__main__":
    in_channels = 16
    out_channels = 64      # 2*O = 128 -> already lane-dense (no output padding)
    num_sample = 4
    batch = 64             # -> 2 batch tiles of 32: pipelining + megacore split

    key = jax.random.PRNGKey(0)
    kp, kn, ks = jax.random.split(key, 3)
    params = init_params(kp, in_channels, out_channels)

    # neighbor_feats arrives flat, exactly as the PyTorch forward expects.
    neighbor_feats = jax.random.normal(kn, (batch * num_sample, in_channels),
                                       jnp.float32)
    self_feats = jax.random.normal(ks, (batch, in_channels), jnp.float32)

    ref = _reference(neighbor_feats, self_feats, num_sample, params)

    # fp32-operand path: verifies the fused block-matmul math against the spec.
    out_f32 = jax.block_until_ready(
        sage_layer(neighbor_feats, self_feats, num_sample, params, use_bf16=False))
    assert out_f32.shape == (batch, 2 * out_channels)
    assert jnp.allclose(out_f32, ref, rtol=1e-2, atol=1e-2), "fp32 kernel mismatch"

    # bf16-operand / fp32-accumulate fast path (halves HBM traffic).
    out_bf16 = jax.block_until_ready(
        sage_layer(neighbor_feats, self_feats, num_sample, params, use_bf16=True))
    assert out_bf16.shape == (batch, 2 * out_channels)
    assert jnp.allclose(out_bf16, ref, rtol=5e-2, atol=5e-2), "bf16 kernel mismatch"

    print("KERNEL_OK")
</pallas_src>

<mosaic_0001>
module attributes {stable_mosaic.version = 11 : i64} {
  func.func @_fused_sage_kernel(%arg0: i32, %arg1: memref<32x80xf32, #tpu.memory_space<vmem>>, %arg2: memref<80x128xf32, #tpu.memory_space<vmem>>, %arg3: memref<32x128xf32, #tpu.memory_space<vmem>>) attributes {dimension_semantics = [#tpu.dimension_semantics<parallel>], iteration_bounds = array<i64: 2>, scalar_prefetch = 0 : i64, scratch_operands = 0 : i64, tpu.core_type = #tpu.core_type<tc>, window_params = [{transform_indices = @transform_0, window_bounds = array<i64: 32, 80>}, {pipeline_mode = #tpu.pipeline_mode<synchronous>, transform_indices = @transform_1, window_bounds = array<i64: 80, 128>}, {transform_indices = @transform_2, window_bounds = array<i64: 32, 128>}]} {
    %c0 = arith.constant 0 : index
    %c0_0 = arith.constant 0 : index
    %0 = vector.load %arg1[%c0, %c0_0] : memref<32x80xf32, #tpu.memory_space<vmem>>, vector<32x80xf32>
    %c0_1 = arith.constant 0 : index
    %c0_2 = arith.constant 0 : index
    %1 = vector.load %arg2[%c0_1, %c0_2] : memref<80x128xf32, #tpu.memory_space<vmem>>, vector<80x128xf32>
    %cst = arith.constant dense<0.000000e+00> : vector<32x128xf32>
    %2 = tpu.matmul %0, %1, %cst {dimension_numbers = #tpu.dot_dimension_numbers<[1], [0], [0], [1], [0, 0, 1, 1], [], []>} : vector<32x80xf32>, vector<80x128xf32>, vector<32x128xf32> -> vector<32x128xf32>
    %c0_3 = arith.constant 0 : index
    %c0_4 = arith.constant 0 : index
    %3 = vector.load %arg3[%c0_3, %c0_4] : memref<32x128xf32, #tpu.memory_space<vmem>>, vector<32x128xf32>
    tpu.vector_store %arg3[%c0_3, %c0_4], %2 {strides = array<i32>} : memref<32x128xf32, #tpu.memory_space<vmem>>, vector<32x128xf32>,
    return
  }
  func.func @transform_0(%arg0: i32) -> (i32, i32) {
    %c0_i32 = arith.constant 0 : i32
    %c0_i32_0 = arith.constant 0 : i32
    return %arg0, %c0_i32 : i32, i32
  }
  func.func @transform_1(%arg0: i32) -> (i32, i32) {
    %c0_i32 = arith.constant 0 : i32
    %c0_i32_0 = arith.constant 0 : i32
    %c0_i32_1 = arith.constant 0 : i32
    return %c0_i32, %c0_i32_0 : i32, i32
  }
  func.func @transform_2(%arg0: i32) -> (i32, i32) {
    %c0_i32 = arith.constant 0 : i32
    %c0_i32_0 = arith.constant 0 : i32
    return %arg0, %c0_i32 : i32, i32
  }
}

</mosaic_0001>

<bundles_post_ra>
// kernel: tpu_custom_call.1
= control target key start
LH: loop header
LB: loop body
LE: loop exit
PB: predicated region body
PF: predicated region fallthrough
CT: control target
= control target key end

     0   :  { %7 = vsyncpa [#allocation3], 0  ;;  %s918_s0 = inlined_call_operand.hbm [shape: f32[64,80], index: 0, kind: input, shape index: {}]   ;;  %s919_s1 = inlined_call_operand.hbm [shape: f32[80,128], index: 1, kind: input, shape index: {}]   ;;  %s920_s2 = inlined_call_operand.hbm [shape: f32[64,128], index: 2, kind: output, shape index: {}]  }
   0x1   :  { %9 = vsyncpa [#allocation3 + $0x1], 0 }
   0x2   :  { %10 = vsyncpa [#allocation6], 0 }
   0x3   :  { %11 = vsyncpa [#allocation4], 0 }
   0x4   :  { %13 = vsyncpa [#allocation4 + $0x1], 0  ;;  %s697_s9 = smov 0   ;;  %s699_s10 = smov 0  }
   0x5   :  { %s701_s11 = smov 0   ;;  %s703_s12 = smov 0  }
   0x6 LB: > { %s718_s13 = sadd.s32 4294967295, %s673_s12   ;;  %s392_s14 = sadd.s32 4294967294, %s673_s12   ;;  %s673_s12 = sphi %s703_s12, %s940_s12   ;;  %s669_s11 = sphi %s701_s11, %s939_s11   ;;  %s665_s10 = sphi %s699_s10, %s938_s10   ;;  %s661_s9 = sphi %s697_s9, %s937_s9  }
   0x7   : > { %p39_p0 = scmp.ne.s32.totalorder %s665_s10, %s661_s9  ;;  %p921_p1 = scmp.eq.s32.totalorder %s718_s13, 0 }
   0x8   : > { %p90_p3 = scmp.eq.s32.totalorder %s392_s14, 1  ;;  %p393_p5 = scmp.ge.s32.totalorder %s673_s12, 1 }
   0x9   : > { %p727_p4 = por %p921_p1, %p39_p0  ;;  %p97_p7 = scmp.lt.s32.totalorder %s673_s12, 3 }
   0xa   : > { %p732_p6 = por %p90_p3, %p39_p0  ;;  %s675_s18 = smov [#allocation5]  }
   0xb   : > { %s924_s15 = scalar_select %p727_p4, 1, 0 }
   0xc   : > { %s925_s16 = scalar_select %p732_p6, 1, 0 }
   0xd   : > { %p737_p8 = pnand %p393_p5, %p97_p7  ;;  %s109_s19 = sshll.u32 %s675_s18, 4  ;;  %s741_s19 = int_to_ptr.vmem [resolvable:$true] %s109_s19 }
   0xe   : > { %s753_s21 = sadd.s32 1, %s673_s12   ;;  %s26_s22 = sadd.s32 1, %s669_s11 }
   0xf   : > { %s926_s17 = scalar_select %p737_p8, 1, 0 }
  0x10   : > { %p492_p9 = pneg %p737_p8  ;;  %s23_s23 = ssub.s32 %s673_s12, %s753_s21 }
  0x11   : > { %s545_s26 = scalar_lea.hbm %s919_s1, 1280 }
  0x12   : > { %p748_p11 = pnand %p492_p9, %p921_p1  ;;  %p546_p12 = scmp.ne.s32.totalorder %s919_s1, %s545_s26 }
  0x13   : > { %p552_p5 = scmp.lt.u32.totalorder %s545_s26, %s919_s1 }
  0x14   : > { %p547_p13 = pneg %p748_p11 }
  0x16   : > { %p548_p0 = pnand %p547_p13, %p546_p12 }
  0x18   : > { %p549_p3 = pneg %p548_p0 }
  0x1a   : > { %p554_p7 = pnand %p552_p5, %p549_p3 }
  0x1c   : > { %557 = shalt.err (!%p554_p7)
}
  0x1d   : > { %s558_s3 = scalar_lea.vmem %s741_s19, 1280  ;;  %p566_p2 = scmp.lt.s32.totalorder %s741_s19, %s741_s19 }
  0x1e   : > { %p559_p9 = scmp.ne.s32.totalorder %s741_s19, %s558_s3  ;;  %p567_p6 = scmp.lt.s32.totalorder %s558_s3, %s558_s3 }
  0x20   : > { %p561_p10 = pnand %p559_p9, %p547_p13  ;;  %p568_p4 = por %p567_p6, %p566_p2 }
  0x22   : > { %p562_p1 = pneg %p561_p10 }
  0x24   : > { %p569_p8 = pnand %p568_p4, %p562_p1 }
  0x26   : > { %572 = shalt.err (!%p569_p8)
}
  0x27   : > { %s676_s4 = smov 128   ;;  %s677_s5 = smov 8  }
  0x28   : > { %495 = dma.hbm_to_vmem [thread:$0]  (!%p748_p11), %s919_s1, 1280, %s741_s19, [#allocation6], %s676_s4, %s676_s4, %s677_s5  }
  0x29   : > { %p24_p1 = scmp.eq.s32.totalorder %s23_s23, 0  ;;  %p33_p2 = scmp.ne.s32.totalorder %s669_s11, %s665_s10 }
  0x2a   : > { %p34_p4 = scmp.eq.s32.totalorder %s673_s12, 0  ;;  %p505_p6 = scmp.lt.s32.totalorder %s673_s12, 2 }
  0x2b   : > { %s787_s8 = scalar_select %p24_p1, %s669_s11, %s26_s22  }
  0x2c   : > { %p35_p8 = por %p34_p4, %p33_p2  ;;  %p928_p10 = scmp.eq.s32.totalorder %s718_s13, 1 }
  0x2d   : > { %s123_s18 = sand.u32 1, %s669_s11   ;;  %s412_s20 = sshll.u32 %s673_s12, 9 }
  0x2e   : > { %p791_p12 = por %p928_p10, %p33_p2  ;;  %s396_s24 = sshll.u32 %s123_s18, 5 }
  0x2f   : > { %s800_s27 = scalar_lea.hbm %s918_s0, %s412_s20  ;;  %s127_s19 = scalar_lea.vmem [#allocation2], %s396_s24 }
  0x30   : > { %s134_s22 = sshll.u32 %s127_s19, 4  ;;  %p802_p11 = pnand %p505_p6, %p35_p8  ;;  %s806_s22 = int_to_ptr.vmem [resolvable:$true] %s134_s22 }
  0x31   : > { %s808_s28 = scalar_lea.sflag [#allocation3], %s123_s18  ;;  %s573_s29 = scalar_lea.hbm %s800_s27, 512 }
  0x32   : > { %p574_p13 = scmp.ne.s32.totalorder %s800_s27, %s573_s29  ;;  %p575_p0 = pneg %p802_p11 }
  0x33   : > { %s578_s6 = scalar_lea.hbm %s918_s0, 1024  ;;  %p579_p7 = scmp.lt.u32.totalorder %s800_s27, %s918_s0 }
  0x34   : > { %p576_p3 = pnand %p575_p0, %p574_p13  ;;  %p580_p9 = scmp.lt.u32.totalorder %s578_s6, %s573_s29 }
  0x35   : > { %p582_p2 = scmp.lt.u32.totalorder %s573_s29, %s800_s27 }
  0x36   : > { %p577_p5 = pneg %p576_p3  ;;  %p581_p1 = por %p580_p9, %p579_p7 }
  0x38   : > { %p583_p4 = por %p582_p2, %p581_p1 }
  0x3a   : > { %p584_p6 = pnand %p583_p4, %p577_p5 }
  0x3c   : > { %587 = shalt.err (!%p584_p6)
}
  0x3d   : > { %s588_s18 = scalar_lea.vmem %s806_s22, 512  ;;  %s678_s24 = smov [#allocation2]  }
  0x3e   : > { %p589_p8 = scmp.ne.s32.totalorder %s806_s22, %s588_s18  ;;  %s593_s25 = sshll.u32 %s678_s24, 4  ;;  %s594_s25 = int_to_ptr.vmem [resolvable:$false] %s593_s25 }
  0x3f   : > { %s595_s26 = scalar_lea.vmem %s594_s25, 1024  ;;  %p596_p3 = scmp.lt.s32.totalorder %s806_s22, %s594_s25 }
  0x40   : > { %p591_p10 = pnand %p589_p8, %p575_p0  ;;  %p597_p7 = scmp.lt.s32.totalorder %s595_s26, %s588_s18 }
  0x42   : > { %p592_p13 = pneg %p591_p10  ;;  %p598_p9 = por %p597_p7, %p596_p3 }
  0x44   : > { %p599_p1 = pnand %p598_p9, %p592_p13 }
  0x46   : > { %602 = shalt.err (!%p599_p1)
}
  0x47   : > { %499 = dma.hbm_to_vmem [thread:$0]  (!%p802_p11), %s800_s27, 512, %s806_s22, %s808_s28, %s676_s4, %s676_s4, %s677_s5  }
  0x48   : > { %p931_p0 = scmp.ne.s32.totalorder %s926_s17, 0 }
  0x49   : > { %s842_s19 = sand.u32 (!%p931_p0), 1, %s665_s10   ;;  %p932_p5 = scmp.ne.s32.totalorder (!%p931_p0), %s924_s15, 0 }
  0x4a   : > { %146 = sbr.rel (%p931_p0) target bundleno = 336 (0x150), region = 28  ;;  %s400_s29 = sshll.u32 (!%p931_p0), %s842_s19, 5 }
  0x4b   : > { %s149_s30 = scalar_lea.sflag (!%p931_p0), [#allocation3], %s842_s19  ;;  %s848_s23 = scalar_lea.vmem (!%p931_p0), [#allocation2], %s400_s29 }
  0x51   : > { %648 = dma.done.wait (%p932_p5), %s149_s30, 512  }
  0x52   : > { %650 = vsyncadd (%p932_p5), %s149_s30, 4294966784  ;;  %p933_p11 = scmp.eq.s32.totalorder %s718_s13, 0 }
  0x54   : > { %652 = dma.done.wait (%p933_p11), [#allocation6], 1280   ;;  %p934_p2 = pmov %p933_p11 }
  0x55   : > { %v183_v0 = vld [vmem:[#allocation5] sm:$0xff]  ;;  %v184_v1 = vld [vmem:[#allocation5 + $0x8] sm:$0xff]  ;;  %v185_v2 = vld [vmem:[#allocation5 + $0x10] sm:$0xff]  ;;  %vm193_vm0 = vcmask 654336   ;;  %s176_s15 = scalar_lea.vmem [#allocation7], %s400_s29  ;;  %s413_s4 = sshll.u32 %s718_s13, 9 }
  0x56   : > { %654 = vsyncadd (%p934_p2), [#allocation6], 4294966016  ;;  %v454_v3 = vpack.c.bf16 %v184_v1, %v183_v0  ;;  %v186_v4 = vld [vmem:[#allocation5 + $0x18] sm:$0xff]  ;;  %v187_v6 = vld [vmem:[#allocation5 + $0x20] sm:$0xff]  ;;  %s309_s17 = sshll.u32 %s176_s15, 4  ;;  %s874_s22 = scalar_lea.hbm %s920_s2, %s413_s4  ;;  %s869_s17 = int_to_ptr.vmem [resolvable:$true] %s309_s17 }
  0x57   : > { %v458_v5 = vpack.c.bf16 %v186_v4, %v185_v2  ;;  %v188_v7 = vld [vmem:[#allocation5 + $0x28] sm:$0xff]  ;;  %v179_v8 = vld [vmem:[%s848_s23] sm:$0xff]  ;;  %v181_v9 = vld [vmem:[%s848_s23 + $0x10] sm:$0xff]  ;;  %s296_s28 = scalar_lea.sflag [#allocation4], %s842_s19  ;;  %s603_s13 = scalar_lea.vmem %s869_s17, 512 }
  0x58   : > { %455 = vmatprep.subr.bf16.mxu0 %v454_v3  ;;  %474 = vmatprep.subr.bf16.mxu1 %v454_v3  ;;  %v462_v10 = vpack.c.bf16 %v188_v7, %v187_v6  ;;  %v189_v11 = vld [vmem:[#allocation5 + $0x30] sm:$0xff]  ;;  %v190_v12 = vld [vmem:[#allocation5 + $0x38] sm:$0xff]  ;;  %v191_v14 = vld [vmem:[#allocation5 + $0x40] sm:$0xff]  ;;  %p604_p4 = scmp.ne.s32.totalorder %s869_s17, %s603_s13  ;;  %s679_s3 = smov [#allocation7]  }
  0x59   : > { %457 = vmatpush3.bf16.msra.mxu0 %v454_v3  ;;  %479 = vmatpush3.bf16.msra.mxu1 %v454_v3  ;;  %v466_v13 = vpack.c.bf16 %v190_v12, %v189_v11  ;;  %v192_v15 = vld [vmem:[#allocation5 + $0x48] sm:$0xff]  ;;  %v182_v18 = vld [vmem:[%s848_s23 + $0x18] sm:$0xff]  ;;  %s607_s6 = sshll.u32 %s679_s3, 4  ;;  %s608_s6 = int_to_ptr.vmem [resolvable:$false] %s607_s6 }
  0x5a   : > { %459 = vmatprep.subr.bf16.mxu0 %v458_v5  ;;  %475 = vmatprep.subr.bf16.mxu1 %v458_v5  ;;  %v470_v16 = vpack.c.bf16 %v192_v15, %v191_v14  ;;  %v180_v17 = vld [vmem:[%s848_s23 + $0x8] sm:$0xff]  ;;  %p605_p6 = pnand %p604_p4, %p791_p12  ;;  %s609_s7 = scalar_lea.vmem %s608_s6, 1024 }
  0x5b   : > { %448 = vmatprep.mubr.msk.f32.mxu0 %vm193_vm0, %v179_v8  ;;  %451 = vmatprep.mubr.msk.f32.mxu1 %vm193_vm0, %v181_v9  ;;  %p610_p10 = scmp.lt.s32.totalorder %s869_s17, %s608_s6  ;;  %p611_p13 = scmp.lt.s32.totalorder %s609_s7, %s603_s13 }
  0x5c   : > { %p606_p8 = pneg %p605_p6 }
  0x5d   : > { %461 = vmatpush3.bf16.msra.mxu0 %v458_v5  ;;  %480 = vmatpush3.bf16.msra.mxu1 %v458_v5  ;;  %p612_p3 = por %p611_p13, %p610_p10 }
  0x5e   : > { %463 = vmatprep.subr.bf16.mxu0 %v462_v10  ;;  %476 = vmatprep.subr.bf16.mxu1 %v462_v10 }
  0x5f   : > { %p613_p7 = pnand %p612_p3, %p606_p8 }
  0x61   : > { %465 = vmatpush3.bf16.msra.mxu0 %v462_v10  ;;  %481 = vmatpush3.bf16.msra.mxu1 %v462_v10 }
  0x62   : > { %467 = vmatprep.subr.bf16.mxu0 %v466_v13  ;;  %477 = vmatprep.subr.bf16.mxu1 %v466_v13 }
  0x65   : > { %469 = vmatpush3.bf16.msra.mxu0 %v466_v13  ;;  %482 = vmatpush3.bf16.msra.mxu1 %v466_v13 }
  0x66   : > { %471 = vmatprep.subr.bf16.mxu0 %v470_v16  ;;  %478 = vmatprep.subr.bf16.mxu1 %v470_v16 }
  0x69   : > { %473 = vmatpush3.bf16.msra.mxu0 %v470_v16  ;;  %483 = vmatpush3.bf16.msra.mxu1 %v470_v16 }
  0x6c   : > { %449 = vmatmul.mubr.msk.f32.vlgmr.msra.gmra.mrb[0].mxu0 %vm193_vm0, %v180_v17  ;;  %452 = vmatmul.mubr.msk.f32.vlgmr.msra.gmra.mrb[0].mxu1 %vm193_vm0, %v182_v18 }
 0x13f   : > { %v450_v19 = vpop.f32.mrb[0].mxu0  ;;  %v453_v20 = vpop.f32.mrb[0].mxu1 }
 0x140   : > { %292 = vst [vmem:[%s176_s15 + $0x8] sm:$0xff] %v450_v19  ;;  %294 = vst [vmem:[%s176_s15 + $0x18] sm:$0xff] %v453_v20  ;;  %v272_v21 = vpop.f32.mrb[1].mxu0  ;;  %v282_v22 = vpop.f32.mrb[1].mxu1 }
 0x141   : > { %291 = vst [vmem:[%s176_s15] sm:$0xff] %v272_v21  ;;  %293 = vst [vmem:[%s176_s15 + $0x10] sm:$0xff] %v282_v22 }
 0x142   : > { %616 = shalt.err (!%p613_p7)
}
 0x143   : > { %s617_s20 = scalar_lea.hbm %s874_s22, 512  ;;  %s621_s25 = scalar_lea.hbm %s920_s2, 1024 }
 0x144   : > { %p618_p9 = scmp.ne.s32.totalorder %s874_s22, %s617_s20  ;;  %p622_p5 = scmp.lt.u32.totalorder %s874_s22, %s920_s2 }
 0x145   : > { %p623_p11 = scmp.lt.u32.totalorder %s621_s25, %s617_s20  ;;  %p625_p4 = scmp.lt.u32.totalorder %s617_s20, %s874_s22 }
 0x146   : > { %p619_p1 = pnand %p618_p9, %p791_p12 }
 0x147   : > { %p624_p2 = por %p623_p11, %p622_p5 }
 0x148   : > { %p620_p0 = pneg %p619_p1 }
 0x149   : > { %p626_p6 = por %p625_p4, %p624_p2 }
 0x14b   : > { %p627_p8 = pnand %p626_p6, %p620_p0 }
 0x14d   : > { %630 = shalt.err (!%p627_p8)
}
 0x14e   : > { %s680_s30 = smov 128   ;;  %s681_s23 = smov 8  }
 0x14f   : > { %490 = dma.vmem_to_hbm [thread:$0]  (%p791_p12), %s869_s17, 512, %s874_s22, %s296_s28, %s680_s30, %s680_s30, %s681_s23  }
 0x150 PF: > { %s324_s15 = sand.u32 1, %s661_s9   ;;  %p935_p10 = scmp.ne.s32.totalorder %s925_s16, 0 }
 0x151   : > { %p936_p13 = scmp.ge.s32.totalorder %s673_s12, 2  ;;  %s325_s4 = scalar_lea.sflag [#allocation4], %s324_s15 }
 0x153   : > { %p501_p3 = pnand %p936_p13, %p935_p10 }
 0x155   : > { %656 = dma.done.wait (!%p501_p3), %s325_s4, 512  }
 0x156   : > { %658 = vsyncadd (!%p501_p3), %s325_s4, 4294966784  ;;  %p16_p7 = scmp.ge.s32.totalorder %s753_s21, 4   ;;  %s937_s9 = smov %s665_s10 }
 0x157   : > { %s938_s10 = smov %s669_s11  ;;  %s939_s11 = smov %s787_s8 }
 0x158   : > { %s940_s12 = smov %s753_s21  ;;  %18 = sbr.rel (!%p16_p7) target bundleno = 6 (0x6), region = 77 }
 0x15f   :  { %330 = vsyncpa [#allocation3], 1 }
 0x160   :  { %332 = vsyncpa [#allocation3 + $0x1], 1 }
 0x161   :  { %333 = vsyncpa [#allocation6], 1 }
 0x162   :  { %334 = vsyncpa [#allocation4], 1 }
 0x163   :  { %336 = vsyncpa [#allocation4 + $0x1], 1 }

</bundles_post_ra>
